<compile_context>
chip_gen: v7x
topology: tpu7x:2x2x1
jax: 0.10.0
libtpu: 0.0.40
codegen_flags: <defaults>
</compile_context>

<pallas_src>
import numpy as np
import jax
import jax.numpy as jnp
from jax import lax
from jax.experimental import pallas as pl
from jax.experimental.pallas import tpu as pltpu


def _resize_matrix(out_size, in_size):
    """Row-interpolation matrix matching F.interpolate(mode='bilinear', align_corners=False)."""
    i = np.arange(out_size, dtype=np.float64)
    scale = in_size / out_size
    src = np.maximum((i + 0.5) * scale - 0.5, 0.0)
    idx0 = np.minimum(np.floor(src).astype(np.int64), in_size - 1)
    idx1 = np.minimum(idx0 + 1, in_size - 1)
    lam = src - idx0
    M = np.zeros((out_size, in_size), dtype=np.float64)
    M[np.arange(out_size), idx0] += 1.0 - lam
    M[np.arange(out_size), idx1] += lam
    return M.astype(np.float32)


def _reflect_clip(coord, size):
    """PyTorch grid_sample reflection padding (align_corners=False) + clip to [0, size-1]."""
    min_c = -0.5
    span = float(size)
    c = jnp.abs(coord - min_c)
    flips = jnp.floor(c / span)
    extra = c - flips * span
    parity = flips - 2.0 * jnp.floor(flips * 0.5)
    refl = jnp.where(parity == 0.0, extra + min_c, span - extra + min_c)
    return jnp.clip(refl, 0.0, span - 1.0)


def _tpu_params():
    """Generation-aware knobs: weight-construction dtype, MXU K depth, lane preference,
    per-block VMEM budget, vmem_limit_bytes, and estimate headroom."""
    kind = ""
    try:
        kind = jax.devices()[0].device_kind.lower()
    except Exception:
        pass
    is_v5 = "v5" in kind
    is_v6 = "v6" in kind
    if is_v5 or is_v6:
        # 128 MiB physical VMEM: larger blocks amortize per-grid-step overhead.
        budget, vmem_limit, headroom = 24 << 20, 64 << 20, 1.3
    else:
        # v7x (64 MiB physical, 32 MiB scoped) or unknown -> conservative.
        budget, vmem_limit, headroom = 7 << 20, 32 << 20, 1.5
    w_dtype = jnp.float32 if is_v5 else jnp.bfloat16   # v5e has no bf16 VALU
    k_mxu = 128 if is_v5 else 256                      # MXU K depth
    lane_pref = 128 if is_v5 else 256                  # preferred lane multiple
    return w_dtype, k_mxu, lane_pref, budget, vmem_limit, headroom


def _pick_block_rows(H, W, C, K1, S2, w_bytes, budget, lane_pref, headroom):
    """Largest row-block TH (divisor of H, lane-aligned) whose per-block footprint fits
    the generation-specific VMEM budget (with headroom for masks / spill scratch)."""
    cands = [th for th in range(1, H + 1)
             if H % th == 0 and ((th * W) % 128 == 0 or th == H)]

    def est(th):
        pb = th * W
        fixed = 2 * C * S2 * K1 * 2 + 2 * (K1 + S2) * 4       # dbl-buffered image tile + iota cols
        per_pix = (
            (2 + 2 + 2) * 4                                   # base_x, base_y, dres (dbl-buffered)
            + 2 * C * 4                                       # output block (dbl-buffered)
            + 14 * 4                                          # coordinate temporaries
            + K1 * (2 * w_bytes + 2)                          # stage-1 weights + temps + bf16 copy
            + C * S2 * 4                                      # stage-1 MXU result
            + 3 * S2 * 4                                      # stage-2 weights + temporaries
            + C * 4                                           # stage-2 accumulator
        )
        return headroom * (fixed + pb * per_pix)

    fit = [th for th in cands if est(th) <= budget]
    if not fit:
        return min(cands)
    pref = [th for th in fit if (th * W) % lane_pref == 0 or th == H]
    return max(pref) if pref else max(fit)


def displacement_forward(image, disp_map, amplitude, angle, block_rows=None):
    """Pallas equivalent of DisplacementLayer.forward.  image: (N, H, W, C) channels-last.
    Returns NHWC float32."""
    N, H, W, C = image.shape
    _, h, w, c = disp_map.shape
    if c not in (1, 3):
        raise ValueError("displacement map must have 1 or 3 channels")
    P = H * W
    f32 = jnp.float32

    w_dtype, k_mxu, lane_pref, budget, vmem_limit, headroom = _tpu_params()
    w_bytes = jnp.dtype(w_dtype).itemsize

    # Contraction-order choice: MXU cost scales with ceil(K / k_mxu); contract first over
    # the spatial axis that pads least; on ties, reduce the smaller axis on the VPU.
    pad_h = -(-H // k_mxu)
    pad_w = -(-W // k_mxu)
    y_first = (pad_h < pad_w) or (pad_h == pad_w and W <= H)
    K1, S2 = (H, W) if y_first else (W, H)   # K1: MXU-contracted axis, S2: VPU-reduced axis

    if block_rows is not None:
        if H % block_rows != 0 or ((block_rows * W) % 128 != 0 and block_rows != H):
            raise ValueError("block_rows must divide H and give a lane-aligned block")
        TH = block_rows
    else:
        TH = _pick_block_rows(H, W, C, K1, S2, w_bytes, budget, lane_pref, headroom)
    PB = TH * W
    T = H // TH

    # ---------------- wrapper-side prep (tiny / separable, done once in XLA) ----------------
    # bilinear resize (align_corners=False) of the channel-averaged map: My @ d @ Mx^T
    My = jnp.asarray(_resize_matrix(H, h))                      # (H, h)
    Mx = jnp.asarray(_resize_matrix(W, w))                      # (W, w)
    d = disp_map.astype(f32)
    d = jnp.mean(d, axis=3) if c == 3 else d[..., 0]            # (N, h, w)
    dres = jnp.einsum("ha,nab,wb->nhw", My, d, Mx).reshape(N, 1, P)

    # per-batch modulation scalars (cos/sin hoisted out of the kernel) -> scalar prefetch
    amp = amplitude.astype(f32)
    ang = angle.astype(f32)
    cax = amp * jnp.cos(ang) * (2.0 / (W - 1))                  # (N,)
    say = amp * jnp.sin(ang) * (2.0 / (H - 1))                  # (N,)

    # base sampling grid, torch.linspace(-1, 1, .) style, flattened row-major (p = i*W + j)
    bxv = jnp.linspace(-1.0, 1.0, W, dtype=f32)
    byv = jnp.linspace(-1.0, 1.0, H, dtype=f32)
    base_x = jnp.broadcast_to(bxv[None, :], (H, W)).reshape(1, 1, P)
    base_y = jnp.broadcast_to(byv[:, None], (H, W)).reshape(1, 1, P)

    # grid-invariant index columns (hoisted; DMA'd once, block index never changes)
    kcol = jnp.arange(K1, dtype=jnp.int32).reshape(K1, 1)
    scol = jnp.arange(S2, dtype=jnp.int32).reshape(S2, 1)

    # channel-major image: rows grouped per channel along the VPU-reduced axis, the
    # MXU-contracted axis last.  Shape (N, C*S2, K1), bf16 for the MXU.
    if y_first:    # img_cm[n, ch*W + x, y] = image[n, y, x, ch]
        img_cm = jnp.transpose(image, (0, 3, 2, 1)).reshape(N, C * W, H)
    else:          # img_cm[n, ch*H + y, x] = image[n, y, x, ch]
        img_cm = jnp.transpose(image, (0, 3, 1, 2)).reshape(N, C * H, W)
    img_cm = img_cm.astype(jnp.bfloat16)

    # ------------------------------------ kernel --------------------------------------------
    def kernel(cax_ref, say_ref, bx_ref, by_ref, kcol_ref, scol_ref,
               dres_ref, img_ref, out_ref):
        n = pl.program_id(0)
        one = jnp.float32(1.0)

        dmod = dres_ref[0]                                    # (1, PB)
        gx = bx_ref[0] + dmod * cax_ref[n]                    # displaced grid x
        gy = by_ref[0] + dmod * say_ref[n]                    # displaced grid y

        # unnormalize (align_corners=False), reflection padding, clip (index math in f32)
        ix = _reflect_clip(((gx + one) * W - one) * 0.5, W)
        iy = _reflect_clip(((gy + one) * H - one) * 0.5, H)

        ix0f = jnp.floor(ix)
        iy0f = jnp.floor(iy)
        tx = ix - ix0f                                        # (1, PB)
        ty = iy - iy0f
        ix0 = ix0f.astype(jnp.int32)
        iy0 = iy0f.astype(jnp.int32)
        ix1 = jnp.minimum(ix0 + 1, W - 1)
        iy1 = jnp.minimum(iy0 + 1, H - 1)

        if y_first:
            k0, k1, tk = iy0, iy1, ty      # MXU-contracted coordinate (size K1 = H)
            s0, s1, ts = ix0, ix1, tx      # VPU-reduced coordinate    (size S2 = W)
        else:
            k0, k1, tk = ix0, ix1, tx
            s0, s1, ts = iy0, iy1, ty

        # stage-1 one-hot interpolation weights (K1, PB); built in bf16 on v6e/v7x,
        # in f32 on v5e (cast to bf16 only at the MXU feed).
        ki = kcol_ref[...]                                    # (K1, 1) int32
        tkw = tk.astype(w_dtype)
        wk = ((1.0 - tkw) * (ki == k0).astype(w_dtype)
              + tkw * (ki == k1).astype(w_dtype)).astype(jnp.bfloat16)

        # stage 1: MXU contraction over K1 (bf16 operands, f32 accumulate)
        mix = jnp.dot(img_ref[0], wk,
                      preferred_element_type=jnp.float32)     # (C*S2, PB)

        # stage 2: (S2, PB) weights + per-channel VPU multiply and sublane reduce
        si = scol_ref[...]                                    # (S2, 1) int32
        ws = (one - ts) * (si == s0).astype(jnp.float32) \
            + ts * (si == s1).astype(jnp.float32)             # (S2, PB)

        parts = []
        for ch in range(C):                                   # C is small (1..4): unrolled
            sub = mix[ch * S2:(ch + 1) * S2, :]               # (S2, PB)
            parts.append(jnp.sum(sub * ws, axis=0, keepdims=True))
        out_ref[0] = jnp.concatenate(parts, axis=0)           # (C, PB), lane-dense store

    grid_spec = pltpu.PrefetchScalarGridSpec(
        num_scalar_prefetch=2,
        grid=(N, T),
        in_specs=[
            pl.BlockSpec((1, 1, PB),      lambda n, t, cax, say: (0, 0, t)),   # base_x
            pl.BlockSpec((1, 1, PB),      lambda n, t, cax, say: (0, 0, t)),   # base_y
            pl.BlockSpec((K1, 1),         lambda n, t, cax, say: (0, 0)),      # kcol iota
            pl.BlockSpec((S2, 1),         lambda n, t, cax, say: (0, 0)),      # scol iota
            pl.BlockSpec((1, 1, PB),      lambda n, t, cax, say: (n, 0, t)),   # dres (per batch)
            pl.BlockSpec((1, C * S2, K1), lambda n, t, cax, say: (n, 0, 0)),   # image (per batch)
        ],
        out_specs=pl.BlockSpec((1, C, PB), lambda n, t, cax, say: (n, 0, t)),
    )

    flops = int(N * (2 * C * S2 * K1 * P + 3 * C * S2 * P))
    bytes_accessed = int(N * (C * S2 * K1 * 2 + C * P * 4 + P * 4)
                         + 2 * P * 4 + (K1 + S2) * 4)

    out_cf = pl.pallas_call(
        kernel,
        out_shape=jax.ShapeDtypeStruct((N, C, P), jnp.float32),
        grid_spec=grid_spec,
        compiler_params=pltpu.CompilerParams(
            dimension_semantics=("parallel", "parallel"),
            vmem_limit_bytes=vmem_limit),
        cost_estimate=pl.CostEstimate(flops=flops, transcendentals=0,
                                      bytes_accessed=bytes_accessed),
    )(cax, say, base_x, base_y, kcol, scol, dres, img_cm)

    # The kernel emits planar (N, C, H*W) so stores stay lane-dense; the NHWC transpose
    # below (required by the module's return convention) is one extra HBM round-trip of
    # the output -- consumers that accept channels-first can skip it.
    return jnp.transpose(out_cf.reshape(N, C, H, W), (0, 2, 3, 1))
    # TODO(synk): the original module ends with `.cpu()`; the device->host transfer is
    # left to the caller (jax.device_get) since it has no in-kernel equivalent.


def ref_forward(image, disp_map, amplitude, angle):
    """Pure-JAX f32 reference with identical index math (exact gather) for a sanity check."""
    N, H, W, C = image.shape
    _, h, w, c = disp_map.shape
    My = jnp.asarray(_resize_matrix(H, h))
    Mx = jnp.asarray(_resize_matrix(W, w))
    d = disp_map.astype(jnp.float32)
    d = jnp.mean(d, axis=3) if c == 3 else d[..., 0]          # (N, h, w)
    dres = jnp.einsum("ha,nab,wb->nhw", My, d, Mx)            # (N, H, W)
    a = amplitude[:, None, None].astype(jnp.float32)
    ang = angle[:, None, None].astype(jnp.float32)
    dmod = dres * a
    dxn = jnp.cos(ang) * dmod * (2.0 / (W - 1))
    dyn = jnp.sin(ang) * dmod * (2.0 / (H - 1))
    xs = jnp.linspace(-1.0, 1.0, W, dtype=jnp.float32)
    ys = jnp.linspace(-1.0, 1.0, H, dtype=jnp.float32)
    gx = xs[None, None, :] + dxn
    gy = ys[None, :, None] + dyn
    ix = _reflect_clip(((gx + 1.0) * W - 1.0) * 0.5, W)
    iy = _reflect_clip(((gy + 1.0) * H - 1.0) * 0.5, H)
    ix0f = jnp.floor(ix); iy0f = jnp.floor(iy)
    tx = ix - ix0f; ty = iy - iy0f
    ix0 = ix0f.astype(jnp.int32); iy0 = iy0f.astype(jnp.int32)
    ix1 = jnp.minimum(ix0 + 1, W - 1); iy1 = jnp.minimum(iy0 + 1, H - 1)
    bidx = jnp.arange(N)[:, None, None]
    img = image.astype(jnp.float32)

    def gather(yy, xx):
        return img[bidx, yy, xx]                              # (N, H, W, C)

    out = ((1 - tx) * (1 - ty))[..., None] * gather(iy0, ix0) \
        + (tx * (1 - ty))[..., None] * gather(iy0, ix1) \
        + ((1 - tx) * ty)[..., None] * gather(iy1, ix0) \
        + (tx * ty)[..., None] * gather(iy1, ix1)
    return out


if __name__ == "__main__":
    def run_case(key, N, H, W, C, h, w, c, block_rows=None, tol=7.5e-2):
        k1, k2, k3, k4 = jax.random.split(key, 4)
        image = jax.random.normal(k1, (N, H, W, C), jnp.float32)
        disp_map = jax.random.normal(k2, (N, h, w, c), jnp.float32)
        amplitude = jax.random.uniform(k3, (N,), jnp.float32, 0.5, 2.0)
        angle = jax.random.uniform(k4, (N,), jnp.float32, 0.0, 2.0 * np.pi)

        out = displacement_forward(image, disp_map, amplitude, angle,
                                   block_rows=block_rows)
        out = jax.block_until_ready(out)
        assert out.shape == (N, H, W, C)

        ref = ref_forward(image, disp_map, amplitude, angle)
        err = float(jnp.max(jnp.abs(out - ref)))
        if not np.isfinite(err) or err > tol:
            raise AssertionError(f"mismatch vs reference, max abs err = {err}")
        return err

    key = jax.random.PRNGKey(0)
    ka, kb, kc = jax.random.split(key, 3)
    # single block, y-first contraction, 3-channel displacement map
    run_case(ka, N=2, H=16, W=16, C=4, h=8, w=8, c=3)
    # multi-block (T=4), y-first, 1-channel displacement map
    run_case(kb, N=1, H=32, W=32, C=3, h=12, w=12, c=1, block_rows=8)
    # multi-block (T=2), wide image -> x-first contraction order
    run_case(kc, N=2, H=8, W=64, C=2, h=4, w=16, c=3, block_rows=4)
    print("KERNEL_OK")
</pallas_src>

<mosaic_0001>
module attributes {stable_mosaic.version = 11 : i64} {
  func.func @kernel(%arg0: i32, %arg1: i32, %arg2: memref<2xf32, #tpu.memory_space<smem>>, %arg3: memref<2xf32, #tpu.memory_space<smem>>, %arg4: memref<1x1x256xf32, #tpu.memory_space<vmem>>, %arg5: memref<1x1x256xf32, #tpu.memory_space<vmem>>, %arg6: memref<16x1xi32, #tpu.memory_space<vmem>>, %arg7: memref<16x1xi32, #tpu.memory_space<vmem>>, %arg8: memref<1x1x256xf32, #tpu.memory_space<vmem>>, %arg9: memref<1x64x16xbf16, #tpu.memory_space<vmem>>, %arg10: memref<1x4x256xf32, #tpu.memory_space<vmem>>) attributes {dimension_semantics = [#tpu.dimension_semantics<parallel>, #tpu.dimension_semantics<parallel>], iteration_bounds = array<i64: 2, 1>, scalar_prefetch = 2 : i64, scratch_operands = 0 : i64, tpu.core_type = #tpu.core_type<tc>, window_params = [{transform_indices = @transform_0, window_bounds = array<i64: 1, 1, 256>}, {transform_indices = @transform_1, window_bounds = array<i64: 1, 1, 256>}, {pipeline_mode = #tpu.pipeline_mode<synchronous>, transform_indices = @transform_2, window_bounds = array<i64: 16, 1>}, {pipeline_mode = #tpu.pipeline_mode<synchronous>, transform_indices = @transform_3, window_bounds = array<i64: 16, 1>}, {transform_indices = @transform_4, window_bounds = array<i64: 1, 1, 256>}, {transform_indices = @transform_5, window_bounds = array<i64: 1, 64, 16>}, {transform_indices = @transform_6, window_bounds = array<i64: 1, 4, 256>}]} {
    %c0 = arith.constant 0 : index
    %c0_0 = arith.constant 0 : index
    %c0_1 = arith.constant 0 : index
    %0 = vector.load %arg8[%c0, %c0_0, %c0_1] : memref<1x1x256xf32, #tpu.memory_space<vmem>>, vector<1x1x256xf32>
    %1 = vector.shape_cast %0 : vector<1x1x256xf32> to vector<1x256xf32>
    %c0_2 = arith.constant 0 : index
    %c0_3 = arith.constant 0 : index
    %c0_4 = arith.constant 0 : index
    %2 = vector.load %arg4[%c0_2, %c0_3, %c0_4] : memref<1x1x256xf32, #tpu.memory_space<vmem>>, vector<1x1x256xf32>
    %3 = vector.shape_cast %2 : vector<1x1x256xf32> to vector<1x256xf32>
    %4 = arith.index_cast %arg0 : i32 to index
    %5 = memref.load %arg2[%4] : memref<2xf32, #tpu.memory_space<smem>>
    %6 = vector.broadcast %5 : f32 to vector<1x256xf32>
    %7 = arith.mulf %1, %6 : vector<1x256xf32>
    %8 = arith.addf %3, %7 : vector<1x256xf32>
    %c0_5 = arith.constant 0 : index
    %c0_6 = arith.constant 0 : index
    %c0_7 = arith.constant 0 : index
    %9 = vector.load %arg5[%c0_5, %c0_6, %c0_7] : memref<1x1x256xf32, #tpu.memory_space<vmem>>, vector<1x1x256xf32>
    %10 = vector.shape_cast %9 : vector<1x1x256xf32> to vector<1x256xf32>
    %11 = arith.index_cast %arg0 : i32 to index
    %12 = memref.load %arg3[%11] : memref<2xf32, #tpu.memory_space<smem>>
    %13 = vector.broadcast %12 : f32 to vector<1x256xf32>
    %14 = arith.mulf %1, %13 : vector<1x256xf32>
    %15 = arith.addf %10, %14 : vector<1x256xf32>
    %cst = arith.constant 1.000000e+00 : f32
    %16 = vector.broadcast %cst : f32 to vector<1x256xf32>
    %17 = arith.addf %8, %16 : vector<1x256xf32>
    %cst_8 = arith.constant 1.600000e+01 : f32
    %18 = vector.broadcast %cst_8 : f32 to vector<1x256xf32>
    %19 = arith.mulf %17, %18 : vector<1x256xf32>
    %cst_9 = arith.constant 1.000000e+00 : f32
    %20 = vector.broadcast %cst_9 : f32 to vector<1x256xf32>
    %21 = arith.subf %19, %20 : vector<1x256xf32>
    %cst_10 = arith.constant 5.000000e-01 : f32
    %22 = vector.broadcast %cst_10 : f32 to vector<1x256xf32>
    %23 = arith.mulf %21, %22 : vector<1x256xf32>
    %cst_11 = arith.constant -5.000000e-01 : f32
    %24 = vector.broadcast %cst_11 : f32 to vector<1x256xf32>
    %25 = arith.subf %23, %24 : vector<1x256xf32>
    %26 = math.absf %25 : vector<1x256xf32>
    %cst_12 = arith.constant 1.600000e+01 : f32
    %27 = vector.broadcast %cst_12 : f32 to vector<1x256xf32>
    %28 = arith.divf %26, %27 : vector<1x256xf32>
    %29 = math.floor %28 : vector<1x256xf32>
    %cst_13 = arith.constant 1.600000e+01 : f32
    %30 = vector.broadcast %cst_13 : f32 to vector<1x256xf32>
    %31 = arith.mulf %29, %30 : vector<1x256xf32>
    %32 = arith.subf %26, %31 : vector<1x256xf32>
    %cst_14 = arith.constant 5.000000e-01 : f32
    %33 = vector.broadcast %cst_14 : f32 to vector<1x256xf32>
    %34 = arith.mulf %29, %33 : vector<1x256xf32>
    %35 = math.floor %34 : vector<1x256xf32>
    %cst_15 = arith.constant 2.000000e+00 : f32
    %36 = vector.broadcast %cst_15 : f32 to vector<1x256xf32>
    %37 = arith.mulf %36, %35 : vector<1x256xf32>
    %38 = arith.subf %29, %37 : vector<1x256xf32>
    %cst_16 = arith.constant 0.000000e+00 : f32
    %39 = vector.broadcast %cst_16 : f32 to vector<1x256xf32>
    %40 = arith.cmpf oeq, %38, %39 : vector<1x256xf32>
    %cst_17 = arith.constant -5.000000e-01 : f32
    %41 = vector.broadcast %cst_17 : f32 to vector<1x256xf32>
    %42 = arith.addf %32, %41 : vector<1x256xf32>
    %cst_18 = arith.constant 1.600000e+01 : f32
    %43 = vector.broadcast %cst_18 : f32 to vector<1x256xf32>
    %44 = arith.subf %43, %32 : vector<1x256xf32>
    %cst_19 = arith.constant -5.000000e-01 : f32
    %45 = vector.broadcast %cst_19 : f32 to vector<1x256xf32>
    %46 = arith.addf %44, %45 : vector<1x256xf32>
    %47 = arith.select %40, %42, %46 : vector<1x256xi1>, vector<1x256xf32>
    %cst_20 = arith.constant 0.000000e+00 : f32
    %cst_21 = arith.constant 1.500000e+01 : f32
    %48 = vector.broadcast %cst_20 : f32 to vector<1x256xf32>
    %49 = arith.maximumf %48, %47 : vector<1x256xf32>
    %50 = vector.broadcast %cst_21 : f32 to vector<1x256xf32>
    %51 = arith.minimumf %50, %49 : vector<1x256xf32>
    %cst_22 = arith.constant 1.000000e+00 : f32
    %52 = vector.broadcast %cst_22 : f32 to vector<1x256xf32>
    %53 = arith.addf %15, %52 : vector<1x256xf32>
    %cst_23 = arith.constant 1.600000e+01 : f32
    %54 = vector.broadcast %cst_23 : f32 to vector<1x256xf32>
    %55 = arith.mulf %53, %54 : vector<1x256xf32>
    %cst_24 = arith.constant 1.000000e+00 : f32
    %56 = vector.broadcast %cst_24 : f32 to vector<1x256xf32>
    %57 = arith.subf %55, %56 : vector<1x256xf32>
    %cst_25 = arith.constant 5.000000e-01 : f32
    %58 = vector.broadcast %cst_25 : f32 to vector<1x256xf32>
    %59 = arith.mulf %57, %58 : vector<1x256xf32>
    %cst_26 = arith.constant -5.000000e-01 : f32
    %60 = vector.broadcast %cst_26 : f32 to vector<1x256xf32>
    %61 = arith.subf %59, %60 : vector<1x256xf32>
    %62 = math.absf %61 : vector<1x256xf32>
    %cst_27 = arith.constant 1.600000e+01 : f32
    %63 = vector.broadcast %cst_27 : f32 to vector<1x256xf32>
    %64 = arith.divf %62, %63 : vector<1x256xf32>
    %65 = math.floor %64 : vector<1x256xf32>
    %cst_28 = arith.constant 1.600000e+01 : f32
    %66 = vector.broadcast %cst_28 : f32 to vector<1x256xf32>
    %67 = arith.mulf %65, %66 : vector<1x256xf32>
    %68 = arith.subf %62, %67 : vector<1x256xf32>
    %cst_29 = arith.constant 5.000000e-01 : f32
    %69 = vector.broadcast %cst_29 : f32 to vector<1x256xf32>
    %70 = arith.mulf %65, %69 : vector<1x256xf32>
    %71 = math.floor %70 : vector<1x256xf32>
    %cst_30 = arith.constant 2.000000e+00 : f32
    %72 = vector.broadcast %cst_30 : f32 to vector<1x256xf32>
    %73 = arith.mulf %72, %71 : vector<1x256xf32>
    %74 = arith.subf %65, %73 : vector<1x256xf32>
    %cst_31 = arith.constant 0.000000e+00 : f32
    %75 = vector.broadcast %cst_31 : f32 to vector<1x256xf32>
    %76 = arith.cmpf oeq, %74, %75 : vector<1x256xf32>
    %cst_32 = arith.constant -5.000000e-01 : f32
    %77 = vector.broadcast %cst_32 : f32 to vector<1x256xf32>
    %78 = arith.addf %68, %77 : vector<1x256xf32>
    %cst_33 = arith.constant 1.600000e+01 : f32
    %79 = vector.broadcast %cst_33 : f32 to vector<1x256xf32>
    %80 = arith.subf %79, %68 : vector<1x256xf32>
    %cst_34 = arith.constant -5.000000e-01 : f32
    %81 = vector.broadcast %cst_34 : f32 to vector<1x256xf32>
    %82 = arith.addf %80, %81 : vector<1x256xf32>
    %83 = arith.select %76, %78, %82 : vector<1x256xi1>, vector<1x256xf32>
    %cst_35 = arith.constant 0.000000e+00 : f32
    %cst_36 = arith.constant 1.500000e+01 : f32
    %84 = vector.broadcast %cst_35 : f32 to vector<1x256xf32>
    %85 = arith.maximumf %84, %83 : vector<1x256xf32>
    %86 = vector.broadcast %cst_36 : f32 to vector<1x256xf32>
    %87 = arith.minimumf %86, %85 : vector<1x256xf32>
    %88 = math.floor %51 : vector<1x256xf32>
    %89 = math.floor %87 : vector<1x256xf32>
    %90 = arith.subf %51, %88 : vector<1x256xf32>
    %91 = arith.subf %87, %89 : vector<1x256xf32>
    %92 = arith.fptosi %88 : vector<1x256xf32> to vector<1x256xi32>
    %93 = arith.fptosi %89 : vector<1x256xf32> to vector<1x256xi32>
    %c1_i32 = arith.constant 1 : i32
    %94 = vector.broadcast %c1_i32 : i32 to vector<1x256xi32>
    %95 = arith.addi %92, %94 : vector<1x256xi32>
    %c15_i32 = arith.constant 15 : i32
    %96 = vector.broadcast %c15_i32 : i32 to vector<1x256xi32>
    %97 = arith.minsi %95, %96 : vector<1x256xi32>
    %c1_i32_37 = arith.constant 1 : i32
    %98 = vector.broadcast %c1_i32_37 : i32 to vector<1x256xi32>
    %99 = arith.addi %93, %98 : vector<1x256xi32>
    %c15_i32_38 = arith.constant 15 : i32
    %100 = vector.broadcast %c15_i32_38 : i32 to vector<1x256xi32>
    %101 = arith.minsi %99, %100 : vector<1x256xi32>
    %c0_39 = arith.constant 0 : index
    %c0_40 = arith.constant 0 : index
    %102 = vector.load %arg6[%c0_39, %c0_40] : memref<16x1xi32, #tpu.memory_space<vmem>>, vector<16x1xi32>
    %103 = arith.truncf %91 : vector<1x256xf32> to vector<1x256xbf16>
    %cst_41 = arith.constant 1.000000e+00 : bf16
    %104 = vector.broadcast %cst_41 : bf16 to vector<1x256xbf16>
    %105 = arith.subf %104, %103 : vector<1x256xbf16>
    %106 = vector.broadcast %102 : vector<16x1xi32> to vector<16x256xi32>
    %107 = vector.broadcast %93 : vector<1x256xi32> to vector<16x256xi32>
    %108 = arith.cmpi eq, %106, %107 : vector<16x256xi32>
    %109 = arith.extui %108 : vector<16x256xi1> to vector<16x256xi32>
    %110 = arith.sitofp %109 : vector<16x256xi32> to vector<16x256xf32>
    %111 = arith.truncf %110 : vector<16x256xf32> to vector<16x256xbf16>
    %112 = vector.broadcast %105 : vector<1x256xbf16> to vector<16x256xbf16>
    %113 = arith.mulf %112, %111 : vector<16x256xbf16>
    %114 = vector.broadcast %102 : vector<16x1xi32> to vector<16x256xi32>
    %115 = vector.broadcast %101 : vector<1x256xi32> to vector<16x256xi32>
    %116 = arith.cmpi eq, %114, %115 : vector<16x256xi32>
    %117 = arith.extui %116 : vector<16x256xi1> to vector<16x256xi32>
    %118 = arith.sitofp %117 : vector<16x256xi32> to vector<16x256xf32>
    %119 = arith.truncf %118 : vector<16x256xf32> to vector<16x256xbf16>
    %120 = vector.broadcast %103 : vector<1x256xbf16> to vector<16x256xbf16>
    %121 = arith.mulf %120, %119 : vector<16x256xbf16>
    %122 = arith.addf %113, %121 : vector<16x256xbf16>
    %c0_42 = arith.constant 0 : index
    %c0_43 = arith.constant 0 : index
    %c0_44 = arith.constant 0 : index
    %123 = vector.load %arg9[%c0_42, %c0_43, %c0_44] : memref<1x64x16xbf16, #tpu.memory_space<vmem>>, vector<1x64x16xbf16>
    %124 = vector.shape_cast %123 : vector<1x64x16xbf16> to vector<64x16xbf16>
    %cst_45 = arith.constant dense<0.000000e+00> : vector<64x256xf32>
    %125 = tpu.matmul %124, %122, %cst_45 {dimension_numbers = #tpu.dot_dimension_numbers<[1], [0], [0], [1], [0, 0, 1, 1], [], []>} : vector<64x16xbf16>, vector<16x256xbf16>, vector<64x256xf32> -> vector<64x256xf32>
    %c0_46 = arith.constant 0 : index
    %c0_47 = arith.constant 0 : index
    %126 = vector.load %arg7[%c0_46, %c0_47] : memref<16x1xi32, #tpu.memory_space<vmem>>, vector<16x1xi32>
    %cst_48 = arith.constant 1.000000e+00 : f32
    %127 = vector.broadcast %cst_48 : f32 to vector<1x256xf32>
    %128 = arith.subf %127, %90 : vector<1x256xf32>
    %129 = vector.broadcast %126 : vector<16x1xi32> to vector<16x256xi32>
    %130 = vector.broadcast %92 : vector<1x256xi32> to vector<16x256xi32>
    %131 = arith.cmpi eq, %129, %130 : vector<16x256xi32>
    %132 = arith.extui %131 : vector<16x256xi1> to vector<16x256xi32>
    %133 = arith.sitofp %132 : vector<16x256xi32> to vector<16x256xf32>
    %134 = vector.broadcast %128 : vector<1x256xf32> to vector<16x256xf32>
    %135 = arith.mulf %134, %133 : vector<16x256xf32>
    %136 = vector.broadcast %126 : vector<16x1xi32> to vector<16x256xi32>
    %137 = vector.broadcast %97 : vector<1x256xi32> to vector<16x256xi32>
    %138 = arith.cmpi eq, %136, %137 : vector<16x256xi32>
    %139 = arith.extui %138 : vector<16x256xi1> to vector<16x256xi32>
    %140 = arith.sitofp %139 : vector<16x256xi32> to vector<16x256xf32>
    %141 = vector.broadcast %90 : vector<1x256xf32> to vector<16x256xf32>
    %142 = arith.mulf %141, %140 : vector<16x256xf32>
    %143 = arith.addf %135, %142 : vector<16x256xf32>
    %144 = vector.extract_strided_slice %125 {offsets = [0, 0], sizes = [16, 256], strides = [1, 1]} : vector<64x256xf32> to vector<16x256xf32>
    %145 = arith.mulf %144, %143 : vector<16x256xf32>
    %cst_49 = arith.constant dense<0.000000e+00> : vector<256xf32>
    %146 = vector.multi_reduction <add>, %145, %cst_49 [0] : vector<16x256xf32> to vector<256xf32>
    %147 = vector.shape_cast %146 : vector<256xf32> to vector<1x256xf32>
    %148 = vector.extract_strided_slice %125 {offsets = [16, 0], sizes = [16, 256], strides = [1, 1]} : vector<64x256xf32> to vector<16x256xf32>
    %149 = arith.mulf %148, %143 : vector<16x256xf32>
    %cst_50 = arith.constant dense<0.000000e+00> : vector<256xf32>
    %150 = vector.multi_reduction <add>, %149, %cst_50 [0] : vector<16x256xf32> to vector<256xf32>
    %151 = vector.shape_cast %150 : vector<256xf32> to vector<1x256xf32>
    %152 = vector.extract_strided_slice %125 {offsets = [32, 0], sizes = [16, 256], strides = [1, 1]} : vector<64x256xf32> to vector<16x256xf32>
    %153 = arith.mulf %152, %143 : vector<16x256xf32>
    %cst_51 = arith.constant dense<0.000000e+00> : vector<256xf32>
    %154 = vector.multi_reduction <add>, %153, %cst_51 [0] : vector<16x256xf32> to vector<256xf32>
    %155 = vector.shape_cast %154 : vector<256xf32> to vector<1x256xf32>
    %156 = vector.extract_strided_slice %125 {offsets = [48, 0], sizes = [16, 256], strides = [1, 1]} : vector<64x256xf32> to vector<16x256xf32>
    %157 = arith.mulf %156, %143 : vector<16x256xf32>
    %cst_52 = arith.constant dense<0.000000e+00> : vector<256xf32>
    %158 = vector.multi_reduction <add>, %157, %cst_52 [0] : vector<16x256xf32> to vector<256xf32>
    %159 = vector.shape_cast %158 : vector<256xf32> to vector<1x256xf32>
    %160 = tpu.concatenate %147, %151, %155, %159 in 0 : vector<1x256xf32>, vector<1x256xf32>, vector<1x256xf32>, vector<1x256xf32> -> vector<4x256xf32>
    %c0_53 = arith.constant 0 : index
    %c0_54 = arith.constant 0 : index
    %c0_55 = arith.constant 0 : index
    %161 = vector.load %arg10[%c0_53, %c0_54, %c0_55] : memref<1x4x256xf32, #tpu.memory_space<vmem>>, vector<1x4x256xf32>
    %162 = vector.shape_cast %161 : vector<1x4x256xf32> to vector<4x256xf32>
    %163 = vector.shape_cast %160 : vector<4x256xf32> to vector<1x4x256xf32>
    tpu.vector_store %arg10[%c0_53, %c0_54, %c0_55], %163 {strides = array<i32>} : memref<1x4x256xf32, #tpu.memory_space<vmem>>, vector<1x4x256xf32>,
    return
  }
  func.func @transform_0(%arg0: i32, %arg1: i32, %arg2: memref<2xf32, #tpu.memory_space<smem>>, %arg3: memref<2xf32, #tpu.memory_space<smem>>) -> (i32, i32, i32) {
    %c0_i32 = arith.constant 0 : i32
    %c0_i32_0 = arith.constant 0 : i32
    %c0_i32_1 = arith.constant 0 : i32
    return %c0_i32, %c0_i32_0, %arg1 : i32, i32, i32
  }
  func.func @transform_1(%arg0: i32, %arg1: i32, %arg2: memref<2xf32, #tpu.memory_space<smem>>, %arg3: memref<2xf32, #tpu.memory_space<smem>>) -> (i32, i32, i32) {
    %c0_i32 = arith.constant 0 : i32
    %c0_i32_0 = arith.constant 0 : i32
    %c0_i32_1 = arith.constant 0 : i32
    return %c0_i32, %c0_i32_0, %arg1 : i32, i32, i32
  }
  func.func @transform_2(%arg0: i32, %arg1: i32, %arg2: memref<2xf32, #tpu.memory_space<smem>>, %arg3: memref<2xf32, #tpu.memory_space<smem>>) -> (i32, i32) {
    %c0_i32 = arith.constant 0 : i32
    %c0_i32_0 = arith.constant 0 : i32
    %c0_i32_1 = arith.constant 0 : i32
    return %c0_i32, %c0_i32_0 : i32, i32
  }
  func.func @transform_3(%arg0: i32, %arg1: i32, %arg2: memref<2xf32, #tpu.memory_space<smem>>, %arg3: memref<2xf32, #tpu.memory_space<smem>>) -> (i32, i32) {
    %c0_i32 = arith.constant 0 : i32
    %c0_i32_0 = arith.constant 0 : i32
    %c0_i32_1 = arith.constant 0 : i32
    return %c0_i32, %c0_i32_0 : i32, i32
  }
  func.func @transform_4(%arg0: i32, %arg1: i32, %arg2: memref<2xf32, #tpu.memory_space<smem>>, %arg3: memref<2xf32, #tpu.memory_space<smem>>) -> (i32, i32, i32) {
    %c0_i32 = arith.constant 0 : i32
    %c0_i32_0 = arith.constant 0 : i32
    return %arg0, %c0_i32, %arg1 : i32, i32, i32
  }
  func.func @transform_5(%arg0: i32, %arg1: i32, %arg2: memref<2xf32, #tpu.memory_space<smem>>, %arg3: memref<2xf32, #tpu.memory_space<smem>>) -> (i32, i32, i32) {
    %c0_i32 = arith.constant 0 : i32
    %c0_i32_0 = arith.constant 0 : i32
    %c0_i32_1 = arith.constant 0 : i32
    return %arg0, %c0_i32, %c0_i32_0 : i32, i32, i32
  }
  func.func @transform_6(%arg0: i32, %arg1: i32, %arg2: memref<2xf32, #tpu.memory_space<smem>>, %arg3: memref<2xf32, #tpu.memory_space<smem>>) -> (i32, i32, i32) {
    %c0_i32 = arith.constant 0 : i32
    %c0_i32_0 = arith.constant 0 : i32
    return %arg0, %c0_i32, %arg1 : i32, i32, i32
  }
}

</mosaic_0001>

<bundles_post_ra>
// kernel: tpu_custom_call.1
= control target key start
LH: loop header
LB: loop body
LE: loop exit
PB: predicated region body
PF: predicated region fallthrough
CT: control target
= control target key end

     0   :  { %s1404_s0 = inlined_call_operand.vmem [shape: f32[2], index: 0, kind: input, shape index: {}]   ;;  %s1405_s2 = inlined_call_operand.vmem [shape: f32[1,1,256], index: 2, kind: input, shape index: {}]   ;;  %s1406_s3 = inlined_call_operand.vmem [shape: f32[1,1,256], index: 3, kind: input, shape index: {}]   ;;  %s1407_s4 = inlined_call_operand.vmem [shape: s32[16,1], index: 4, kind: input, shape index: {}]   ;;  %s1408_s5 = inlined_call_operand.vmem [shape: s32[16,1], index: 5, kind: input, shape index: {}]   ;;  %s1409_s6 = inlined_call_operand.vmem [shape: f32[2,1,256], index: 6, kind: input, shape index: {}]   ;;  %s1410_s7 = inlined_call_operand.vmem [shape: bf16[2,64,16], index: 7, kind: input, shape index: {}]   ;;  %s1411_s8 = inlined_call_operand.hbm [shape: f32[2,4,256], index: 8, kind: output, shape index: {}]   ;;  %s1412_s1 = inlined_call_operand.vmem [shape: f32[2], index: 1, kind: input, shape index: {}]  }
   0x1   :  { %1413 = sst [smem:[#allocation9_spill]] %s1407_s4  ;;  %s13_s29 = sshll.u32 %s1404_s0, 4  ;;  %s14_s29 = int_to_ptr.vmem [resolvable:$true] %s13_s29 }
   0x2   :  { %s17_s10 = sshll.u32 %s1412_s1, 4  ;;  %s1043_s11 = scalar_lea.vmem %s14_s29, 16  ;;  %s18_s10 = int_to_ptr.vmem [resolvable:$true] %s17_s10 }
   0x3   :  { %p1044_p0 = scmp.ne.s32.totalorder %s14_s29, %s1043_s11  ;;  %p1048_p1 = scmp.lt.s32.totalorder %s14_s29, %s14_s29 }
   0x4   :  { %p1049_p2 = scmp.lt.s32.totalorder %s1043_s11, %s1043_s11 }
   0x6   :  { %p1050_p3 = por %p1049_p2, %p1048_p1 }
   0x8   :  { %p1051_p4 = pnand %p1050_p3, %p1044_p0 }
   0xa   :  { %1054 = shalt.err (!%p1051_p4)  }
   0xb   :  { %s1149_s12 = smov [#allocation3]   ;;  %s1055_s13 = scalar_lea.vmem %s18_s10, 16 }
   0xc   :  { %16 = dma.vmem_to_smem %s14_s29, 16, %s1149_s12, [#allocation2] }
   0xd   :  { %p1056_p5 = scmp.ne.s32.totalorder %s18_s10, %s1055_s13  ;;  %p1060_p6 = scmp.lt.s32.totalorder %s18_s10, %s18_s10 }
   0xe   :  { %p1061_p7 = scmp.lt.s32.totalorder %s1055_s13, %s1055_s13 }
  0x10   :  { %p1062_p8 = por %p1061_p7, %p1060_p6 }
  0x12   :  { %p1063_p9 = pnand %p1062_p8, %p1056_p5 }
  0x14   :  { %1066 = shalt.err (!%p1063_p9)  }
  0x15   :  { %s1150_s0 = smov [#allocation4]  }
  0x16   :  { %20 = dma.vmem_to_smem %s18_s10, 16, %s1150_s0, [#allocation2] }
  0x17   :  { %1119 = dma.done.wait [#allocation2], 32 }
  0x18   :  { %1120 = vsyncadd [#allocation2], 4294967264 }
  0x19   :  { %22 = sfence }
  0x1a   :  { %23 = vsyncpa [#allocation6], 0 }
  0x1b   :  { %25 = vsyncpa [#allocation6 + $0x1], 0  ;;  %s1205_s1 = smov 0   ;;  %s1207_s14 = smov 0  }
  0x1c   :  { %s1209_s15 = smov 0   ;;  %s1211_s16 = smov 0  }
  0x1d   :  { %s1213_s17 = smov 0   ;;  %s1215_s18 = smov 0  }
  0x1e LB: > { %s926_s19 = sadd.s32 4294967295, %s1147_s18   ;;  %s927_s20 = sadd.s32 4294967294, %s1147_s18   ;;  %s1147_s18 = sphi %s1215_s18, %s31_s18   ;;  %s1143_s17 = sphi %s1213_s17, %s1421_s17   ;;  %s1139_s16 = sphi %s1211_s16, %s1420_s16   ;;  %s1135_s15 = sphi %s1209_s15, %s1419_s15   ;;  %s1131_s14 = sphi %s1207_s14, %s1418_s14   ;;  %s1127_s1 = sphi %s1205_s1, %s1417_s1  }
  0x1f   : > { %s43_s21 = sadd.s32 1, %s1143_s17  ;;  %s200_s22 = sadd.s32 1, %s1135_s15 }
  0x20   : > { %p45_p10 = scmp.ge.s32.totalorder %s43_s21, 2  ;;  %p210_p11 = scmp.ne.s32.totalorder %s1135_s15, %s1131_s14 }
  0x21   : > { %p211_p12 = scmp.eq.s32.totalorder %s926_s19, 1  ;;  %p216_p13 = scmp.ne.s32.totalorder %s1131_s14, %s1127_s1 }
  0x22   : > { %s1423_s21 = smov (%p45_p10, %s43_s21), 0  ;;  %p217_p1 = scmp.eq.s32.totalorder %s927_s20, 1 }
  0x23   : > { %p1245_p0 = por %p211_p12, %p210_p11  ;;  %s195_s24 = ssub.s32 %s1143_s17, %s1423_s21 }
  0x24   : > { %p932_p2 = scmp.ge.s32.totalorder %s1147_s18, 1  ;;  %p198_p3 = scmp.eq.s32.totalorder %s195_s24, 0 }
  0x25   : > { %p1252_p4 = por %p217_p1, %p216_p13  ;;  %p277_p5 = scmp.lt.s32.totalorder %s1147_s18, 3 }
  0x26   : > { %s1258_s26 = scalar_select %p198_p3, %s1135_s15, %s200_s22  }
  0x27   : > { %p278_p6 = pnand %p932_p2, %p277_p5 }
  0x28   : > { %s1416_s4 = sld [smem:[#allocation9_spill]] (!%p278_p6)  ;;  %v1151_v1 = vmov (!%p278_p6), 0   ;;  %p334_p7 = scmp.lt.s32.totalorder (!%p278_p6), %s1139_s16, 1  ;;  %v631_v3 = vld [vmem:[%s1408_s5] sm:$0xff] (!%p278_p6)  ;;  %v632_v4 = vld [vmem:[%s1408_s5 + $0x8] sm:$0xff] (!%p278_p6)  ;;  %v419_v37 = vlaneseq (!%p278_p6)  ;;  %vm545_vm12 = vcmask (!%p278_p6), 130048  }
  0x29   : > { %281 = sbr.rel (%p278_p6) target bundleno = 449 (0x1c1), region = 44  ;;  %1037 = vset.pattern.permute.xlu0 (!%p278_p6), %v1151_v1  ;;  %590 = vmatprep.mubr.bf16.mxu0 (!%p278_p6), %v1151_v1  ;;  %s357_s0 = sld [smem:[#allocation4 + %s1139_s16]] (!%p278_p6)  ;;  %v356_v8 = vld [vmem:[%s1406_s3] sm:$0x3] (!%p278_p6) }
  0x2a   : > { %610 = vmatprep.mubr.bf16.mxu1 (!%p278_p6), %v1151_v1  ;;  %1038 = vset.pattern.permute.xlu1 (!%p278_p6), %v1151_v1  ;;  %v351_v9 = vld [vmem:[%s1405_s2] sm:$0x3] (!%p278_p6)  ;;  %v420_v41 = vshrl.u32 (!%p278_p6), %v419_v37, 7  ;;  %s1153_s29 = smov (!%p278_p6), [#allocation5]  }
  0x2b   : > { %635 = vperm.xlu1 (!%p278_p6), %1038, %v631_v3   ;;  %s1071_s30 = sshll.u32 (!%p278_p6), %s1153_s29, 4  ;;  %s1072_s30 = int_to_ptr.vmem [resolvable:$false] %s1071_s30 }
  0x2c   : > { %v1294_v45 = vsub.s32 (!%p278_p6), 0, %v420_v41  ;;  %v425_v46 = vsub.s32 (!%p278_p6), 1, %v420_v41 }
  0x2e   : > { %v416_v0 = vld [vmem:[%s1416_s4] sm:$0xff] (!%p278_p6)  ;;  %v417_v2 = vld [vmem:[%s1416_s4 + $0x8] sm:$0xff] (!%p278_p6)  ;;  %s352_s4 = sld [smem:[#allocation3 + %s1139_s16]] (!%p278_p6) }
  0x2f   : > { %434 = vperm.xlu0 (!%p278_p6), %1037, %v416_v0   ;;  %v358_v6 = vstv (!%p278_p6), %s357_s0  ;;  %638 = vperm.xlu1 (!%p278_p6), %1038, %v632_v4   ;;  %s971_s0 = sshll.u32 (!%p278_p6), %s1139_s16, 7 }
  0x30   : > { %s335_s9 = scalar_select %p334_p7, %s1139_s16, 1 }
  0x31   : > { %s1355_s27 = scalar_lea.hbm %s1411_s8, %s971_s0 }
  0x32   : > { %s970_s10 = sshll.u32 %s335_s9, 5  ;;  %s934_s19 = sshll.u32 %s335_s9, 1 }
  0x33   : > { %437 = vperm.xlu0 %1037, %v417_v2   ;;  %s1275_s13 = scalar_lea.vmem %s1410_s7, %s970_s10  ;;  %s340_s28 = scalar_lea.vmem %s1409_s6, %s934_s19 }
  0x34   : > { %v350_v5 = vld [vmem:[%s340_s28] sm:$0x3]  ;;  %v353_v10 = vstv %s352_s4  ;;  %s320_s4 = sand.u32 1, %s1131_s14   ;;  %s1073_s10 = scalar_lea.vmem %s1072_s30, 256 }
  0x35   : > { %v359_v7 = vmul.f32 %v358_v6, %v350_v5  ;;  %v354_v11 = vmul.f32 %v353_v10, %v350_v5  ;;  %s801_s28 = scalar_lea.sflag [#allocation6], %s320_s4 }
  0x37   : > { %v360_v12 = vadd.f32 %v359_v7, %v356_v8  ;;  %v355_v13 = vadd.f32 %v354_v11, %v351_v9 }
  0x39   : > { %v361_v14 = vadd.f32 1.0, %v355_v13  ;;  %v383_v15 = vadd.f32 1.0, %v360_v12 }
  0x3b   : > { %v362_v16 = vmul.f32 16.0, %v361_v14  ;;  %v384_v18 = vmul.f32 16.0, %v383_v15 }
  0x3d   : > { %v937_v17 = vadd.f32 -1.0, %v362_v16  ;;  %v939_v21 = vadd.f32 -1.0, %v384_v18 }
  0x3f   : > { %v364_v19 = vmul.f32 0.5, %v937_v17  ;;  %v386_v24 = vmul.f32 0.5, %v939_v21 }
  0x41   : > { %v938_v20 = vadd.f32 0.5, %v364_v19  ;;  %v940_v28 = vadd.f32 0.5, %v386_v24 }
  0x43   : > { %v366_v22 = vand.u32 2147483647, %v938_v20  ;;  %v388_v33 = vand.u32 2147483647, %v940_v28 }
  0x45   : > { %v368_v23 = vmul.f32 0.0625, %v366_v22  ;;  %v389_v38 = vmul.f32 0.0625, %v388_v33 }
  0x47   : > { %v369_v25 = vfloor.f32 %v368_v23  ;;  %v390_v43 = vfloor.f32 %v389_v38 }
  0x49   : > { %v370_v26 = vmul.f32 16.0, %v369_v25  ;;  %v372_v27 = vmul.f32 0.5, %v369_v25  ;;  %v393_v49 = vmul.f32 0.5, %v390_v43  ;;  %v391_v54 = vmul.f32 16.0, %v390_v43 }
  0x4b   : > { %v371_v29 = vsub.f32 %v366_v22, %v370_v26  ;;  %v373_v30 = vfloor.f32 %v372_v27  ;;  %v394_v59 = vfloor.f32 %v393_v49  ;;  %v392_v62 = vsub.f32 %v388_v33, %v391_v54 }
  0x4d   : > { %v374_v31 = vmul.f32 2.0, %v373_v30  ;;  %v378_v32 = vsub.f32 16.0, %v371_v29  ;;  %v377_v34 = vadd.f32 -0.5, %v371_v29  ;;  %v395_v2 = vmul.f32 2.0, %v394_v59 }
  0x4e   : > { %v399_v3 = vsub.f32 16.0, %v392_v62  ;;  %v398_v5 = vadd.f32 -0.5, %v392_v62  ;;  %v1040_v62 = vld [vmem:[%s1275_s13 + $0x10] sm:$0xff]  }
  0x4f   : > { %v375_v35 = vsub.f32 %v369_v25, %v374_v31  ;;  %v379_v36 = vadd.f32 -0.5, %v378_v32  ;;  %v396_v4 = vsub.f32 %v390_v43, %v395_v2  ;;  %v1041_v2 = vld [vmem:[%s1275_s13 + $0x8] sm:$0xff]  }
  0x50   : > { %v400_v6 = vadd.f32 -0.5, %v399_v3  ;;  %v1042_v3 = vld [vmem:[%s1275_s13 + $0x18] sm:$0xff]  }
  0x51   : > { %vm376_vm0 = vcmp.eq.f32.partialorder %v375_v35, 0.0  ;;  %vm397_vm2 = vcmp.eq.f32.partialorder %v396_v4, 0.0 }
  0x52   : > { %v380_v39 = vsel %vm376_vm0, %v377_v34, %v379_v36  ;;  %v401_v7 = vsel %vm397_vm2, %v398_v5, %v400_v6  ;;  %v1152_v36 = vmov 0.0  }
  0x53   : > { %v381_v40 = vmax.f32 %v380_v39, 0.0  ;;  %v402_v8 = vmax.f32 %v401_v7, 0.0 }
  0x55   : > { %v382_v42 = vmin.f32 %v381_v40, 15.0  ;;  %v403_v9 = vmin.f32 %v402_v8, 15.0 }
  0x57   : > { %v404_v44 = vfloor.f32 %v382_v42  ;;  %v405_v10 = vfloor.f32 %v403_v9 }
  0x59   : > { %v406_v47 = vsub.f32 %v382_v42, %v404_v44  ;;  %v974_v48 = vtrunc.f32 %v404_v44  ;;  %v976_v11 = vtrunc.f32 %v405_v10  ;;  %v407_v13 = vsub.f32 %v403_v9, %v405_v10 }
  0x5b   : > { %v975_v50 = vcvt.f32.s32 %v974_v48  ;;  %v633_v51 = vsub.f32 1.0, %v406_v47  ;;  %v1297_v52 = vrot.slane %v406_v47, %v1294_v45  ;;  %v1299_v53 = vrot.slane %v406_v47, %v425_v46 }
  0x5c   : > { %v977_v12 = vcvt.f32.s32 %v976_v11  ;;  %v426_v15 = vrot.slane %v407_v13, %v425_v46  ;;  %v422_v16 = vrot.slane %v407_v13, %v1294_v45 }
  0x5d   : > { %v410_v55 = vadd.s32 1, %v975_v50  ;;  %v1302_v56 = vrot.slane %v975_v50, %v1294_v45  ;;  %v1304_v57 = vrot.slane %v975_v50, %v425_v46  ;;  %v1307_v58 = vrot.slane %v633_v51, %v1294_v45 }
  0x5e   : > { %v1309_v60 = vrot.slane %v633_v51, %v425_v46  ;;  %v413_v14 = vadd.s32 1, %v977_v12  ;;  %v430_v17 = vpack.c.bf16 %v426_v15, %v426_v15  ;;  %v429_v18 = vpack.c.bf16 %v422_v16, %v422_v16 }
  0x5f   : > { %vm411_vm1 = vcmp.lt.s32.totalorder %v410_v55, 15  ;;  %v442_v22 = vrot.slane %v977_v12, %v1294_v45  ;;  %v446_v23 = vrot.slane %v977_v12, %v425_v46 }
  0x60   : > { %v412_v61 = vsel %vm411_vm1, %v410_v55, 15  ;;  %vm414_vm3 = vcmp.lt.s32.totalorder %v413_v14, 15  ;;  %v432_v20 = vsub.bf16 1065369472, %v430_v17  ;;  %v431_v21 = vsub.bf16 1065369472, %v429_v18 }
  0x61   : > { %v1312_v63 = vrot.slane %v412_v61, %v1294_v45  ;;  %v1314_v0 = vrot.slane %v412_v61, %v425_v46  ;;  %v415_v19 = vsel %vm414_vm3, %v413_v14, 15  ;;  %v507_v27 = vpack.i.b16 %v430_v17, %v430_v17  ;;  %v1039_v61 = vld [vmem:[%s1275_s13] sm:$0xff]   ;;  %s1348_s13 = sshll.u32 %s320_s4, 3 }
  0x62   : > { %v480_v24 = vrot.slane %v415_v19, %v1294_v45  ;;  %v484_v25 = vrot.slane %v415_v19, %v425_v46  ;;  %v469_v26 = vpack.i.b16 %v432_v20, %v432_v20  ;;  %v462_v28 = vpack.i.b16 %v431_v21, %v431_v21  ;;  %s322_s19 = scalar_lea.vmem [#allocation5], %s1348_s13 }
  0x63   : > { %v500_v29 = vpack.i.b16 %v429_v18, %v429_v18  ;;  %v512_v32 = vrot.slane %v507_v27, %v1294_v45  ;;  %s817_s20 = sshll.u32 %s322_s19, 4  ;;  %s1357_s20 = int_to_ptr.vmem [resolvable:$true] %s817_s20 }
  0x64   : > { %v474_v31 = vrot.slane %v469_v26, %v1294_v45  ;;  %v467_v33 = vrot.slane %v462_v28, %v1294_v45  ;;  %s1067_s16 = scalar_lea.vmem %s1357_s20, 128  ;;  %p1074_p11 = scmp.lt.s32.totalorder %s1357_s20, %s1072_s30 }
  0x65   : > { %v505_v34 = vrot.slane %v500_v29, %v1294_v45  ;;  %p1068_p8 = scmp.ne.s32.totalorder %s1357_s20, %s1067_s16  ;;  %p1075_p12 = scmp.lt.s32.totalorder %s1073_s10, %s1067_s16 }
  0x67   : > { %p1069_p9 = pnand %p1068_p8, %p1245_p0  ;;  %p1076_p13 = por %p1075_p12, %p1074_p11 }
  0x69   : > { %p1070_p10 = pneg %p1069_p9 }
  0x6b   : > { %p1077_p1 = pnand %p1076_p13, %p1070_p10 }
  0xaa   : > { %v636_v4 = vpop.permute.xlu1 %635 }
  0xab   : > { %vm648_vm13 = vcmp.eq.s32.totalorder %v636_v4, %v1302_v56  ;;  %vm649_vm14 = vcmp.eq.s32.totalorder %v636_v4, %v1304_v57  ;;  %vm683_vm15 = vcmp.eq.s32.totalorder %v636_v4, %v1312_v63  ;;  %vm684_vm0 = vcmp.eq.s32.totalorder %v636_v4, %v1314_v0 }
  0xac   : > { %v957_v5 = vsel %vm648_vm13, 1.0, %v1152_v36  ;;  %v958_v6 = vsel %vm649_vm14, 1.0, %v1152_v36  ;;  %v961_v7 = vsel %vm683_vm15, 1.0, %v1152_v36  ;;  %v962_v8 = vsel %vm684_vm0, 1.0, %v1152_v36 }
  0xad   : > { %v671_v9 = vmul.f32 %v957_v5, %v1307_v58  ;;  %v706_v10 = vmul.f32 %v961_v7, %v1297_v52  ;;  %v707_v11 = vmul.f32 %v962_v8, %v1299_v53 }
  0xae   : > { %v435_v30 = vpop.permute.xlu0 %434  ;;  %v639_v12 = vpop.permute.xlu1 %638 }
  0xaf   : > { %vm448_vm4 = vcmp.eq.s32.totalorder %v435_v30, %v446_v23  ;;  %vm486_vm5 = vcmp.eq.s32.totalorder %v435_v30, %v484_v25  ;;  %vm447_vm6 = vcmp.eq.s32.totalorder %v435_v30, %v442_v22  ;;  %vm485_vm7 = vcmp.eq.s32.totalorder %v435_v30, %v480_v24 }
  0xb0   : > { %v942_v37 = vsel %vm448_vm4, 1.0, %v1152_v36  ;;  %v946_v38 = vsel %vm486_vm5, 1.0, %v1152_v36  ;;  %v941_v39 = vsel %vm447_vm6, 1.0, %v1152_v36  ;;  %v945_v40 = vsel %vm485_vm7, 1.0, %v1152_v36 }
  0xb1   : > { %vm650_vm1 = vcmp.eq.s32.totalorder %v639_v12, %v1302_v56  ;;  %vm651_vm2 = vcmp.eq.s32.totalorder %v639_v12, %v1304_v57  ;;  %vm685_vm3 = vcmp.eq.s32.totalorder %v639_v12, %v1312_v63  ;;  %vm686_vm4 = vcmp.eq.s32.totalorder %v639_v12, %v1314_v0 }
  0xb2   : > { %v438_v35 = vpop.permute.xlu0 %437  ;;  %v959_v13 = vsel %vm650_vm1, 1.0, %v1152_v36  ;;  %v960_v14 = vsel %vm651_vm2, 1.0, %v1152_v36  ;;  %v963_v15 = vsel %vm685_vm3, 1.0, %v1152_v36  ;;  %v964_v16 = vsel %vm686_vm4, 1.0, %v1152_v36 }
  0xb3   : > { %vm449_vm8 = vcmp.eq.s32.totalorder %v438_v35, %v442_v22  ;;  %vm450_vm9 = vcmp.eq.s32.totalorder %v438_v35, %v446_v23  ;;  %vm487_vm10 = vcmp.eq.s32.totalorder %v438_v35, %v480_v24  ;;  %vm488_vm11 = vcmp.eq.s32.totalorder %v438_v35, %v484_v25 }
  0xb4   : > { %v943_v41 = vsel %vm449_vm8, 1.0, %v1152_v36  ;;  %v944_v42 = vsel %vm450_vm9, 1.0, %v1152_v36  ;;  %v947_v43 = vsel %vm487_vm10, 1.0, %v1152_v36  ;;  %v948_v44 = vsel %vm488_vm11, 1.0, %v1152_v36 }
  0xb5   : > { %v460_v46 = vpack.c.bf16 %v944_v42, %v942_v37  ;;  %v498_v47 = vpack.c.bf16 %v948_v44, %v946_v38  ;;  %v459_v48 = vpack.c.bf16 %v943_v41, %v941_v39  ;;  %v497_v45 = vpack.c.bf16 %v947_v43, %v945_v40 }
  0xb6   : > { %v673_v17 = vmul.f32 %v959_v13, %v1307_v58  ;;  %v674_v18 = vmul.f32 %v960_v14, %v1309_v60  ;;  %v708_v19 = vmul.f32 %v963_v15, %v1297_v52  ;;  %v709_v20 = vmul.f32 %v964_v16, %v1299_v53 }
  0xb7   : > { %v476_v49 = vmul.bf16 %v474_v31, %v460_v46  ;;  %v514_v50 = vmul.bf16 %v512_v32, %v498_v47  ;;  %v475_v51 = vmul.bf16 %v467_v33, %v459_v48  ;;  %v513_v54 = vmul.bf16 %v505_v34, %v497_v45 }
  0xb8   : > { %v712_v21 = vadd.f32 %v708_v19, %v673_v17  ;;  %v713_v56 = vadd.f32 %v709_v20, %v674_v18  ;;  %v710_v22 = vadd.f32 %v706_v10, %v671_v9  ;;  %vm786_vm5 = vcmask 1040384  }
  0xb9   : > { %v516_v55 = vadd.bf16 %v514_v50, %v476_v49  ;;  %v515_v59 = vadd.bf16 %v513_v54, %v475_v51  ;;  %vm789_vm6 = vcmask 1041408   ;;  %vm792_vm7 = vcmask 1042432  }
  0xbb   : > { %558 = vmatprep.subr.bf16.mxu0 %v516_v55  ;;  %972 = vmatprep.subr.bf16.mxu1 %v516_v55 }
  0xbc   : > { %559 = vmatpush1.bf16.msra.mxu0 %v515_v59  ;;  %973 = vmatpush1.bf16.msra.mxu1 %v515_v59 }
  0xbf   : > { %953 = vmatmul.mubr.msk.bf16.vlgmr.msra.gmra.mrb[0].mxu0 %vm545_vm12, %v1039_v61  ;;  %955 = vmatmul.mubr.msk.bf16.vlgmr.msra.gmra.mrb[0].mxu1 %vm545_vm12, %v1040_v62 }
  0xc0   : > { %600 = vmatprep.mubr.bf16.mxu0 %v1151_v1  ;;  %620 = vmatprep.mubr.bf16.mxu1 %v1151_v1  ;;  %v672_v1 = vmul.f32 %v958_v6, %v1309_v60 }
  0xc2   : > { %v711_v57 = vadd.f32 %v707_v11, %v672_v1 }
  0xc7   : > { %954 = vmatmul.mubr.msk.bf16.gmra.mrb[4].mxu0 %vm545_vm12, %v1041_v2  ;;  %956 = vmatmul.mubr.msk.bf16.gmra.mrb[4].mxu1 %vm545_vm12, %v1042_v3 }
 0x192   : > { %v592_v23 = vpop.f32.mrb[0].mxu0  ;;  %v612_v63 = vpop.f32.mrb[0].mxu1 }
 0x193   : > { %v714_v24 = vmul.f32 %v710_v22, %v592_v23  ;;  %v750_v0 = vmul.f32 %v710_v22, %v612_v63  ;;  %v594_v25 = vpop.f32.mrb[1].mxu0  ;;  %v614_v26 = vpop.f32.mrb[1].mxu1 }
 0x194   : > { %v715_v27 = vmul.f32 %v711_v57, %v594_v25  ;;  %v751_v28 = vmul.f32 %v711_v57, %v614_v26  ;;  %v596_v29 = vpop.f32.mrb[2].mxu0  ;;  %v616_v58 = vpop.f32.mrb[2].mxu1 }
 0x195   : > { %v716_v30 = vmul.f32 %v712_v21, %v596_v29  ;;  %v752_v60 = vmul.f32 %v712_v21, %v616_v58  ;;  %v598_v31 = vpop.f32.mrb[3].mxu0  ;;  %v618_v52 = vpop.f32.mrb[3].mxu1 }
 0x196   : > { %v717_v32 = vmul.f32 %v713_v56, %v598_v31  ;;  %v753_v53 = vmul.f32 %v713_v56, %v618_v52 }
 0x197   : > { %v718_v33 = vadd.f32 %v716_v30, %v714_v24  ;;  %v754_v34 = vadd.f32 %v752_v60, %v750_v0 }
 0x198   : > { %v725_v35 = vadd.f32 %v717_v32, %v715_v27  ;;  %v761_v36 = vadd.f32 %v753_v53, %v751_v28 }
 0x199   : > { %v719_v37 = vrot.slane %v718_v33, 4  ;;  %v755_v38 = vrot.slane %v754_v34, 4 }
 0x19a   : > { %v726_v39 = vrot.slane %v725_v35, 4  ;;  %v762_v40 = vrot.slane %v761_v36, 4  ;;  %v602_v41 = vpop.f32.mrb[4].mxu0  ;;  %v622_v42 = vpop.f32.mrb[4].mxu1 }
 0x19b   : > { %v720_v43 = vadd.f32 %v719_v37, %v718_v33  ;;  %v732_v44 = vmul.f32 %v710_v22, %v602_v41  ;;  %v768_v46 = vmul.f32 %v710_v22, %v622_v42  ;;  %v604_v47 = vpop.f32.mrb[5].mxu0  ;;  %v624_v48 = vpop.f32.mrb[5].mxu1  ;;  %v756_v45 = vadd.f32 %v755_v38, %v754_v34 }
 0x19c   : > { %v727_v49 = vadd.f32 %v726_v39, %v725_v35  ;;  %v733_v50 = vmul.f32 %v711_v57, %v604_v47  ;;  %v769_v51 = vmul.f32 %v711_v57, %v624_v48  ;;  %v606_v54 = vpop.f32.mrb[6].mxu0  ;;  %v626_v55 = vpop.f32.mrb[6].mxu1  ;;  %v763_v59 = vadd.f32 %v762_v40, %v761_v36 }
 0x19d   : > { %v734_v61 = vmul.f32 %v712_v21, %v606_v54  ;;  %v770_v62 = vmul.f32 %v712_v21, %v626_v55  ;;  %v608_v2 = vpop.f32.mrb[7].mxu0  ;;  %v628_v3 = vpop.f32.mrb[7].mxu1  ;;  %v721_v6 = vrot.slane %v720_v43, 2  ;;  %v757_v9 = vrot.slane %v756_v45, 2 }
 0x19e   : > { %v735_v4 = vmul.f32 %v713_v56, %v608_v2  ;;  %v771_v5 = vmul.f32 %v713_v56, %v628_v3  ;;  %v728_v1 = vrot.slane %v727_v49, 2  ;;  %v764_v12 = vrot.slane %v763_v59, 2 }
 0x19f   : > { %v736_v7 = vadd.f32 %v734_v61, %v732_v44  ;;  %v772_v8 = vadd.f32 %v770_v62, %v768_v46  ;;  %v722_v17 = vadd.f32 %v721_v6, %v720_v43  ;;  %v758_v20 = vadd.f32 %v757_v9, %v756_v45 }
 0x1a0   : > { %v743_v10 = vadd.f32 %v735_v4, %v733_v50  ;;  %v779_v11 = vadd.f32 %v771_v5, %v769_v51  ;;  %v729_v21 = vadd.f32 %v728_v1, %v727_v49  ;;  %v765_v57 = vadd.f32 %v764_v12, %v763_v59 }
 0x1a1   : > { %v737_v13 = vrot.slane %v736_v7, 4  ;;  %v773_v14 = vrot.slane %v772_v8, 4  ;;  %v723_v25 = vrot.slane %v722_v17, 1  ;;  %v759_v28 = vrot.slane %v758_v20, 1 }
 0x1a2   : > { %v744_v15 = vrot.slane %v743_v10, 4  ;;  %v780_v16 = vrot.slane %v779_v11, 4  ;;  %v730_v29 = vrot.slane %v729_v21, 1  ;;  %v766_v60 = vrot.slane %v765_v57, 1 }
 0x1a3   : > { %v738_v18 = vadd.f32 %v737_v13, %v736_v7  ;;  %v774_v19 = vadd.f32 %v773_v14, %v772_v8  ;;  %v724_v33 = vadd.f32 %v723_v25, %v722_v17  ;;  %v760_v35 = vadd.f32 %v759_v28, %v758_v20 }
 0x1a4   : > { %v745_v56 = vadd.f32 %v744_v15, %v743_v10  ;;  %v781_v22 = vadd.f32 %v780_v16, %v779_v11  ;;  %v731_v36 = vadd.f32 %v730_v29, %v729_v21  ;;  %v767_v38 = vadd.f32 %v766_v60, %v765_v57 }
 0x1a5   : > { %v739_v23 = vrot.slane %v738_v18, 2  ;;  %v775_v63 = vrot.slane %v774_v19, 2 }
 0x1a6   : > { %v746_v24 = vrot.slane %v745_v56, 2  ;;  %v782_v0 = vrot.slane %v781_v22, 2 }
 0x1a7   : > { %v740_v26 = vadd.f32 %v739_v23, %v738_v18  ;;  %v776_v27 = vadd.f32 %v775_v63, %v774_v19 }
 0x1a8   : > { %v747_v58 = vadd.f32 %v746_v24, %v745_v56  ;;  %v783_v30 = vadd.f32 %v782_v0, %v781_v22 }
 0x1a9   : > { %v741_v31 = vrot.slane %v740_v26, 1  ;;  %v777_v52 = vrot.slane %v776_v27, 1 }
 0x1aa   : > { %v748_v32 = vrot.slane %v747_v58, 1  ;;  %v784_v53 = vrot.slane %v783_v30, 1 }
 0x1ab   : > { %v742_v34 = vadd.f32 %v741_v31, %v740_v26  ;;  %v778_v39 = vadd.f32 %v777_v52, %v776_v27 }
 0x1ac   : > { %v749_v37 = vadd.f32 %v748_v32, %v747_v58  ;;  %v785_v41 = vadd.f32 %v784_v53, %v783_v30 }
 0x1ad   : > { %v787_v40 = vsel %vm786_vm5, %v724_v33, %v742_v34 }
 0x1ae   : > { %v788_v42 = vsel %vm786_vm5, %v731_v36, %v749_v37  ;;  %v790_v43 = vsel %vm789_vm6, %v787_v40, %v760_v35 }
 0x1af   : > { %v791_v44 = vsel %vm789_vm6, %v788_v42, %v767_v38  ;;  %v793_v46 = vsel %vm792_vm7, %v790_v43, %v778_v39 }
 0x1b0   : > { %v794_v47 = vsel %vm792_vm7, %v791_v44, %v785_v41 }
 0x1b1   : > { %v797_v48 = vcombine.low %v793_v46, %v794_v47 }
 0x1b3   : > { %799 = vst [vmem:[%s322_s19] sm:$0xff] %v797_v48 }
 0x1b4   : > { %1080 = shalt.err (!%p1077_p1)
}
 0x1b5   : > { %s1081_s9 = scalar_lea.hbm %s1355_s27, 128  ;;  %s1085_s4 = scalar_lea.hbm %s1411_s8, 256 }
 0x1b6   : > { %p1082_p2 = scmp.ne.s32.totalorder %s1355_s27, %s1081_s9  ;;  %p1086_p6 = scmp.lt.u32.totalorder %s1355_s27, %s1411_s8 }
 0x1b7   : > { %p1087_p7 = scmp.lt.u32.totalorder %s1085_s4, %s1081_s9  ;;  %p1089_p9 = scmp.lt.u32.totalorder %s1081_s9, %s1355_s27 }
 0x1b8   : > { %p1083_p3 = pnand %p1082_p2, %p1245_p0 }
 0x1b9   : > { %p1088_p8 = por %p1087_p7, %p1086_p6 }
 0x1ba   : > { %p1084_p5 = pneg %p1083_p3 }
 0x1bb   : > { %p1090_p10 = por %p1089_p9, %p1088_p8 }
 0x1bd   : > { %p1091_p11 = pnand %p1090_p10, %p1084_p5 }
 0x1bf   : > { %1094 = shalt.err (!%p1091_p11)
}
 0x1c0   : > { %978 = dma.vmem_to_hbm [thread:$0]  (%p1245_p0), %s1357_s20, 128, %s1355_s27, %s801_s28  }
 0x1c1 PF: > { %p984_p12 = scmp.ge.s32.totalorder %s1147_s18, 2  ;;  %s829_s19 = sand.u32 1, %s1127_s1  }
 0x1c2   : > { %s830_s22 = scalar_lea.sflag [#allocation6], %s829_s19 }
 0x1c3   : > { %p981_p13 = pnand %p984_p12, %p1252_p4 }
 0x1c5   : > { %1122 = dma.done.wait (!%p981_p13), %s830_s22, 128  }
 0x1c6   : > { %1124 = vsyncadd (!%p981_p13), %s830_s22, 4294967168  ;;  %s31_s18 = sadd.s32 1, %s1147_s18   ;;  %s1417_s1 = smov %s1131_s14 }
 0x1c7   : > { %p28_p1 = scmp.ge.s32.totalorder %s31_s18, 4   ;;  %s1418_s14 = smov %s1135_s15 }
 0x1c8   : > { %s1419_s15 = smov %s1258_s26  ;;  %s1420_s16 = smov %s1143_s17 }
 0x1c9   : > { %s1421_s17 = smov %s1423_s21  ;;  %30 = sbr.rel (!%p28_p1) target bundleno = 30 (0x1e), region = 88 }
 0x1d0   :  { %835 = vsyncpa [#allocation6], 1 }
 0x1d1   :  { %837 = vsyncpa [#allocation6 + $0x1], 1 }

</bundles_post_ra>
